<compile_context>
chip_gen: v7x
topology: tpu7x:2x2x1
jax: 0.10.0
libtpu: 0.0.40
codegen_flags: <defaults>
</compile_context>

<pallas_src>
import functools

import jax
import jax.numpy as jnp
import numpy as np
from jax.experimental import pallas as pl
from jax.experimental.pallas import tpu as pltpu

_MINUS = -100.0
_VMEM_LIMIT_BYTES = 32 * 1024 * 1024   # scoped-VMEM limit; safe on v5e/v6e/v7x


def _hw_params():
    """Returns (tensorcores_per_chip, per-step x-tile byte budget), generation-aware."""
    kind = ""
    try:
        kind = jax.devices()[0].device_kind.lower()
    except Exception:
        pass
    two_core = "7" in kind                        # v7x: 2 TCs share HBM, 64 MiB VMEM/TC
    budget = (4 << 20) if two_core else (8 << 20)  # v5e/v6e: 128 MiB VMEM -> bigger tiles
    return (2 if two_core else 1), budget


def _choose_td(L, D, itemsize, budget, min_tb, extra_row_bytes):
    """Lane (D) tile: full D unless even a min_tb-row tile blows the budget."""
    full_row = L * D * itemsize + extra_row_bytes
    if min_tb * full_row <= budget or D % 128 != 0:
        # TODO(synk): no lane tiling when D is not a multiple of 128 (rare); the tile
        # may then exceed the soft budget and rely on vmem_limit_bytes.
        return D, 1
    for k in range(D // 128, 0, -1):
        td = k * 128
        if D % td != 0:
            continue
        if min_tb * (L * td * itemsize + extra_row_bytes) <= budget:
            return td, D // td
    return 128, D // 128


def _choose_batch_tiling(B, row_bytes, budget, num_cores):
    """Returns (b_pad, tb). Padding is at most 7 rows and only when B must be split."""
    if B <= 8:
        return B, B                              # full-dim block: always legal, zero pad
    whole_fits = B * row_bytes <= budget
    want_split = num_cores >= 2 and B >= 16 and B % 8 == 0   # split only when pad-free
    if whole_fits and not want_split:
        return B, B                              # one big block, zero pad
    b_pad = -(-B // 8) * 8                       # pad <= 7 rows (zero when B % 8 == 0)
    max_rows = max(8, (budget // max(row_bytes, 1)) // 8 * 8)
    if whole_fits and want_split:
        max_rows = min(max_rows, b_pad // 2)     # force >= 2 blocks for the 2 cores
    cands = [t for t in range(8, b_pad + 1, 8) if b_pad % t == 0 and t <= max_rows]
    if not cands:
        cands = [8]
    if num_cores >= 2:
        even = [t for t in cands if (b_pad // t) % 2 == 0]
        if even:
            return b_pad, max(even)              # balanced HBM traffic across both TCs
    return b_pad, max(cands)


def _pad_rows(arr, b_pad):
    b = arr.shape[0]
    if b_pad == b:
        return arr
    return jnp.pad(arr, [(0, b_pad - b)] + [(0, 0)] * (arr.ndim - 1))


def _masked_pool_kernel(x_ref, mask_ref, o_ref, *, segment_num, d_full, d_tile, n_d):
    # x_ref:    (tb, L, td) float
    # mask_ref: (tb, L)     int32 (dense lane-major tile)
    # o_ref:    (tb, S * D) float (revisited across the D-tile grid axis when n_d > 1)
    x = x_ref[...]                               # (tb, L, td) -- loaded once per tile
    m3 = mask_ref[...][:, :, None]               # (tb, L, 1)
    if n_d > 1:
        d_off = pl.multiple_of(pl.program_id(1) * d_tile, 128)
    for s in range(segment_num):
        # mask_embedding(mask) is one-hot on segment s (token value s+1); token 0 -> 0.
        # (1 - onehot) * (-100) == 0 where mask == s+1 else -100 (matches PyTorch
        # exactly, including the "-100 can be defeated by huge activations" behavior).
        penalty = jnp.where(m3 == (s + 1), 0.0, _MINUS).astype(x.dtype)
        pooled = jnp.max(x + penalty, axis=1)    # (tb, td), XLU sublane reduction
        if n_d > 1:
            o_ref[:, pl.ds(s * d_full + d_off, d_tile)] = pooled
        else:
            o_ref[:, s * d_full:(s + 1) * d_full] = pooled


def _plain_pool_kernel(x_ref, o_ref):
    # x_ref: (tb, L, td), o_ref: (tb, td) -- dense lane-major store.
    o_ref[...] = jnp.max(x_ref[...], axis=1)


class MaxPoolPallas:
    """Pallas TPU port of PCNN_Att MaxPool (full-sequence / piecewise max pooling)."""

    def __init__(self, kernel_size, segment_num=None, x_tile_budget_bytes=None):
        self.kernel_size = kernel_size
        self.segment_num = segment_num
        self._num_cores, auto_budget = _hw_params()
        self._budget = int(x_tile_budget_bytes) if x_tile_budget_bytes else auto_budget
        if segment_num is not None:
            # Deterministic, non-trainable embedding table, identical to the PyTorch
            # init: row 0 = zeros, rows 1..segment_num = identity. (The kernel realizes
            # the same lookup with equality comparisons.)
            self.mask_embedding_weight = jnp.asarray(
                np.concatenate(
                    [np.zeros((1, segment_num)), np.identity(segment_num)], axis=0
                ),
                dtype=jnp.float32,
            )
            self._minus = _MINUS

    def __call__(self, x, mask=None):
        B, L, D = x.shape
        assert self.kernel_size == L, "kernel implements full-sequence pooling"
        itemsize = x.dtype.itemsize

        masked = not (mask is None or self.segment_num is None or self.segment_num == 1)
        mask_row_bytes = L * 4 if masked else 0

        td, n_d = _choose_td(L, D, itemsize, self._budget, min(B, 8), mask_row_bytes)
        row_bytes = L * td * itemsize + mask_row_bytes
        b_pad, tb = _choose_batch_tiling(B, row_bytes, self._budget, self._num_cores)
        n_b = b_pad // tb

        xp = _pad_rows(x, b_pad)
        cparams = pltpu.CompilerParams(
            dimension_semantics=("parallel", "arbitrary" if masked else "parallel"),
            vmem_limit_bytes=_VMEM_LIMIT_BYTES,
        )
        x_spec = pl.BlockSpec((tb, L, td), lambda b, d: (b, 0, d))

        if not masked:
            out = pl.pallas_call(
                _plain_pool_kernel,
                out_shape=jax.ShapeDtypeStruct((b_pad, D), x.dtype),
                grid=(n_b, n_d),
                in_specs=[x_spec],
                out_specs=pl.BlockSpec((tb, td), lambda b, d: (b, d)),
                compiler_params=cparams,
                cost_estimate=pl.CostEstimate(
                    flops=int(B) * L * D,
                    transcendentals=0,
                    bytes_accessed=int(B) * L * D * itemsize + int(B) * D * itemsize,
                ),
            )(xp)
            return out[:B]

        S = self.segment_num
        maskp = _pad_rows(mask.astype(jnp.int32), b_pad)       # (b_pad, L) dense tile
        kernel = functools.partial(
            _masked_pool_kernel, segment_num=S, d_full=D, d_tile=td, n_d=n_d
        )
        out = pl.pallas_call(
            kernel,
            out_shape=jax.ShapeDtypeStruct((b_pad, S * D), x.dtype),
            grid=(n_b, n_d),
            in_specs=[
                x_spec,
                pl.BlockSpec((tb, L), lambda b, d: (b, 0)),
            ],
            out_specs=pl.BlockSpec((tb, S * D), lambda b, d: (b, 0)),
            compiler_params=cparams,
            cost_estimate=pl.CostEstimate(
                flops=2 * S * int(B) * L * D,
                transcendentals=0,
                bytes_accessed=int(B) * L * D * itemsize
                + int(B) * L * 4
                + int(B) * S * D * itemsize,
            ),
        )(xp, maskp)
        # torch.cat([pool1, pool2, pool3], 1) -> (B, S*D, 1), segment-major; the
        # reshape below is a free metadata op on the lane-dense (B, S*D) result.
        return out[:B].reshape(B, S * D, 1)


def _reference_masked(x, mask, segment_num):
    table = jnp.asarray(
        np.concatenate(
            [np.zeros((1, segment_num)), np.identity(segment_num)], axis=0
        ),
        dtype=x.dtype,
    )
    emb = table[mask]                                  # (B, L, S)
    m = 1.0 - jnp.transpose(emb, (0, 2, 1))            # (B, S, L)
    xt = jnp.transpose(x, (0, 2, 1))                   # (B, D, L)
    pools = [
        jnp.max(xt + _MINUS * m[:, s:s + 1, :], axis=-1)   # (B, D)
        for s in range(segment_num)
    ]
    return jnp.concatenate(pools, axis=1)[..., None]   # (B, S*D, 1)


if __name__ == "__main__":
    key = jax.random.PRNGKey(0)
    segment_num = 3

    # --- Config 1: tiny spec-consistent shapes (single full-batch block, n_d=1) ---
    kx, km, key = jax.random.split(key, 3)
    B, L, D = 2, 8, 32
    x = jax.random.normal(kx, (B, L, D), dtype=jnp.float32)
    mask = jax.random.randint(km, (B, L), 0, segment_num + 1, dtype=jnp.int32)
    mp = MaxPoolPallas(kernel_size=L, segment_num=segment_num)

    out_masked = mp(x, mask)
    jax.block_until_ready(out_masked)
    ref_masked = _reference_masked(x, mask, segment_num)
    assert out_masked.shape == (B, segment_num * D, 1)
    assert jnp.allclose(out_masked, ref_masked, atol=1e-6)

    out_plain = mp(x, None)
    jax.block_until_ready(out_plain)
    assert out_plain.shape == (B, D)
    assert jnp.allclose(out_plain, jnp.max(x, axis=1), atol=1e-6)

    # --- Config 2: lane-full D=128, odd batch (no padding: full-dim batch block) ---
    kx2, km2, key = jax.random.split(key, 3)
    B2, L2, D2 = 5, 16, 128
    x2 = jax.random.normal(kx2, (B2, L2, D2), dtype=jnp.float32)
    mask2 = jax.random.randint(km2, (B2, L2), 0, segment_num + 1, dtype=jnp.int32)
    mp2 = MaxPoolPallas(kernel_size=L2, segment_num=segment_num)

    out2 = mp2(x2, mask2)
    jax.block_until_ready(out2)
    assert jnp.allclose(out2, _reference_masked(x2, mask2, segment_num), atol=1e-6)

    out2p = mp2(x2, None)
    jax.block_until_ready(out2p)
    assert jnp.allclose(out2p, jnp.max(x2, axis=1), atol=1e-6)

    # --- Config 3: forced small tile budget to exercise the multi-block batch path
    #     (b_pad=24, tb=8, pad-free) and the D-tiling path (td=128, n_d=2), including
    #     the revisited lane-dense output block with 128-aligned dynamic stores. ---
    kx3, km3, key = jax.random.split(key, 3)
    B3, L3, D3 = 24, 16, 256
    x3 = jax.random.normal(kx3, (B3, L3, D3), dtype=jnp.float32)
    mask3 = jax.random.randint(km3, (B3, L3), 0, segment_num + 1, dtype=jnp.int32)
    mp3 = MaxPoolPallas(kernel_size=L3, segment_num=segment_num,
                        x_tile_budget_bytes=64 * 1024)

    out3 = mp3(x3, mask3)
    jax.block_until_ready(out3)
    assert jnp.allclose(out3, _reference_masked(x3, mask3, segment_num), atol=1e-6)

    out3p = mp3(x3, None)
    jax.block_until_ready(out3p)
    assert jnp.allclose(out3p, jnp.max(x3, axis=1), atol=1e-6)

    print("KERNEL_OK")
</pallas_src>

<mosaic_0001>
module attributes {stable_mosaic.version = 11 : i64} {
  func.func @_masked_pool_kernel(%arg0: i32, %arg1: i32, %arg2: memref<2x8x32xf32, #tpu.memory_space<vmem>>, %arg3: memref<2x8xi32, #tpu.memory_space<vmem>>, %arg4: memref<2x96xf32, #tpu.memory_space<vmem>>) attributes {dimension_semantics = [#tpu.dimension_semantics<parallel>, #tpu.dimension_semantics<arbitrary>], iteration_bounds = array<i64: 1, 1>, scalar_prefetch = 0 : i64, scratch_operands = 0 : i64, tpu.core_type = #tpu.core_type<tc>, window_params = [{transform_indices = @transform_0, window_bounds = array<i64: 2, 8, 32>}, {transform_indices = @transform_1, window_bounds = array<i64: 2, 8>}, {transform_indices = @transform_2, window_bounds = array<i64: 2, 96>}]} {
    %c0 = arith.constant 0 : index
    %c0_0 = arith.constant 0 : index
    %c0_1 = arith.constant 0 : index
    %0 = vector.load %arg2[%c0, %c0_0, %c0_1] : memref<2x8x32xf32, #tpu.memory_space<vmem>>, vector<2x8x32xf32>
    %c0_2 = arith.constant 0 : index
    %c0_3 = arith.constant 0 : index
    %1 = vector.load %arg3[%c0_2, %c0_3] : memref<2x8xi32, #tpu.memory_space<vmem>>, vector<2x8xi32>
    %2 = vector.shape_cast %1 : vector<2x8xi32> to vector<2x8x1xi32>
    %c1_i32 = arith.constant 1 : i32
    %3 = vector.broadcast %c1_i32 : i32 to vector<2x8x1xi32>
    %4 = arith.cmpi eq, %2, %3 : vector<2x8x1xi32>
    %cst = arith.constant 0.000000e+00 : f32
    %cst_4 = arith.constant -1.000000e+02 : f32
    %5 = vector.broadcast %cst : f32 to vector<2x8x1xf32>
    %6 = vector.broadcast %cst_4 : f32 to vector<2x8x1xf32>
    %7 = arith.select %4, %5, %6 : vector<2x8x1xi1>, vector<2x8x1xf32>
    %8 = vector.broadcast %7 : vector<2x8x1xf32> to vector<2x8x32xf32>
    %9 = arith.addf %0, %8 : vector<2x8x32xf32>
    %cst_5 = arith.constant dense<0xFF800000> : vector<2x32xf32>
    %10 = vector.multi_reduction <maximumf>, %9, %cst_5 [1] : vector<2x8x32xf32> to vector<2x32xf32>
    %c0_6 = arith.constant 0 : index
    %c0_7 = arith.constant 0 : index
    %11 = vector.load %arg4[%c0_6, %c0_7] : memref<2x96xf32, #tpu.memory_space<vmem>>, vector<2x32xf32>
    tpu.vector_store %arg4[%c0_6, %c0_7], %10 {strides = array<i32>} : memref<2x96xf32, #tpu.memory_space<vmem>>, vector<2x32xf32>,
    %c2_i32 = arith.constant 2 : i32
    %12 = vector.broadcast %c2_i32 : i32 to vector<2x8x1xi32>
    %13 = arith.cmpi eq, %2, %12 : vector<2x8x1xi32>
    %cst_8 = arith.constant 0.000000e+00 : f32
    %cst_9 = arith.constant -1.000000e+02 : f32
    %14 = vector.broadcast %cst_8 : f32 to vector<2x8x1xf32>
    %15 = vector.broadcast %cst_9 : f32 to vector<2x8x1xf32>
    %16 = arith.select %13, %14, %15 : vector<2x8x1xi1>, vector<2x8x1xf32>
    %17 = vector.broadcast %16 : vector<2x8x1xf32> to vector<2x8x32xf32>
    %18 = arith.addf %0, %17 : vector<2x8x32xf32>
    %cst_10 = arith.constant dense<0xFF800000> : vector<2x32xf32>
    %19 = vector.multi_reduction <maximumf>, %18, %cst_10 [1] : vector<2x8x32xf32> to vector<2x32xf32>
    %c0_11 = arith.constant 0 : index
    %c32 = arith.constant 32 : index
    %20 = vector.load %arg4[%c0_11, %c32] : memref<2x96xf32, #tpu.memory_space<vmem>>, vector<2x32xf32>
    tpu.vector_store %arg4[%c0_11, %c32], %19 {strides = array<i32>} : memref<2x96xf32, #tpu.memory_space<vmem>>, vector<2x32xf32>,
    %c3_i32 = arith.constant 3 : i32
    %21 = vector.broadcast %c3_i32 : i32 to vector<2x8x1xi32>
    %22 = arith.cmpi eq, %2, %21 : vector<2x8x1xi32>
    %cst_12 = arith.constant 0.000000e+00 : f32
    %cst_13 = arith.constant -1.000000e+02 : f32
    %23 = vector.broadcast %cst_12 : f32 to vector<2x8x1xf32>
    %24 = vector.broadcast %cst_13 : f32 to vector<2x8x1xf32>
    %25 = arith.select %22, %23, %24 : vector<2x8x1xi1>, vector<2x8x1xf32>
    %26 = vector.broadcast %25 : vector<2x8x1xf32> to vector<2x8x32xf32>
    %27 = arith.addf %0, %26 : vector<2x8x32xf32>
    %cst_14 = arith.constant dense<0xFF800000> : vector<2x32xf32>
    %28 = vector.multi_reduction <maximumf>, %27, %cst_14 [1] : vector<2x8x32xf32> to vector<2x32xf32>
    %c0_15 = arith.constant 0 : index
    %c64 = arith.constant 64 : index
    %29 = vector.load %arg4[%c0_15, %c64] : memref<2x96xf32, #tpu.memory_space<vmem>>, vector<2x32xf32>
    tpu.vector_store %arg4[%c0_15, %c64], %28 {strides = array<i32>} : memref<2x96xf32, #tpu.memory_space<vmem>>, vector<2x32xf32>,
    return
  }
  func.func @transform_0(%arg0: i32, %arg1: i32) -> (i32, i32, i32) {
    %c0_i32 = arith.constant 0 : i32
    %c0_i32_0 = arith.constant 0 : i32
    return %arg0, %c0_i32, %arg1 : i32, i32, i32
  }
  func.func @transform_1(%arg0: i32, %arg1: i32) -> (i32, i32) {
    %c0_i32 = arith.constant 0 : i32
    %c0_i32_0 = arith.constant 0 : i32
    return %arg0, %c0_i32 : i32, i32
  }
  func.func @transform_2(%arg0: i32, %arg1: i32) -> (i32, i32) {
    %c0_i32 = arith.constant 0 : i32
    %c0_i32_0 = arith.constant 0 : i32
    return %arg0, %c0_i32 : i32, i32
  }
}

</mosaic_0001>

<bundles_post_ra>
// kernel: tpu_custom_call.1
= control target key start
LH: loop header
LB: loop body
LE: loop exit
PB: predicated region body
PF: predicated region fallthrough
CT: control target
= control target key end

     0   :  { %7 = vsyncpa [#allocation3], 0  ;;  %s255_s0 = inlined_call_operand.hbm [shape: f32[2,8,32], index: 0, kind: input, shape index: {}]   ;;  %s256_s1 = inlined_call_operand.vmem [shape: s32[2,8], index: 1, kind: input, shape index: {}]   ;;  %s257_s2 = inlined_call_operand.hbm [shape: f32[2,96], index: 2, kind: output, shape index: {}]  }
   0x1   :  { %8 = vsyncpa [#allocation4], 0  ;;  %s197_s9 = smov [#allocation2]   ;;  %s149_s13 = scalar_lea.hbm %s255_s0, 256 }
   0x2   :  { %s14_s10 = sshll.u32 %s197_s9, 4  ;;  %p150_p0 = scmp.ne.s32.totalorder %s255_s0, %s149_s13  ;;  %s15_s10 = int_to_ptr.vmem [resolvable:$true] %s14_s10 }
   0x3   :  { %p153_p1 = scmp.lt.u32.totalorder %s149_s13, %s255_s0 }
   0x5   :  { %p155_p2 = pnand %p153_p1, %p150_p0 }
   0x7   :  { %158 = shalt.err (!%p155_p2)
}
   0x8   :  { %s159_s18 = scalar_lea.vmem %s15_s10, 256  ;;  %p164_p4 = scmp.lt.s32.totalorder %s15_s10, %s15_s10 }
   0x9   :  { %p160_p3 = scmp.ne.s32.totalorder %s15_s10, %s159_s18  ;;  %p165_p5 = scmp.lt.s32.totalorder %s159_s18, %s159_s18 }
   0xb   :  { %p166_p6 = por %p165_p5, %p164_p4 }
   0xd   :  { %p167_p7 = pnand %p166_p6, %p160_p3 }
   0xf   :  { %170 = shalt.err (!%p167_p7)
}
  0x10   :  { %s198_s19 = smov 128   ;;  %s199_s20 = smov 8  }
  0x11   :  { %20 = dma.hbm_to_vmem [thread:$0]  %s255_s0, 256, %s15_s10, [#allocation3], %s198_s19, %s198_s19, %s199_s20  }
  0x12   :  { %193 = dma.done.wait [#allocation3], 256  }
  0x13   :  { %194 = vsyncadd [#allocation3], 4294967040  ;;  %v29_v0 = vlaneseq  ;;  %v28_v4 = vld [vmem:[%s256_s1] sm:$0x3]  ;;  %vm49_vm3 = vcmask 261120   ;;  %v200_v9 = vmov -100.0  }
  0x14   :  { %v26_v8 = vld [vmem:[#allocation2] sm:$0xff]  ;;  %v27_v17 = vld [vmem:[#allocation2 + $0x8] sm:$0xff]  ;;  %vm66_vm7 = vcmask 1041409   ;;  %vm69_vm8 = vcmask 254976   ;;  %s201_s0 = smov 32   ;;  %s202_s1 = smov 64  }
  0x15   :  { %v30_v1 = vshrl.u32 %v29_v0, 7  ;;  %vm97_vm9 = vcmask 517376   ;;  %s203_s25 = smov [#allocation5]   ;;  %vm125_vm10 = vcmask 779776  }
  0x16   :  { %s133_s26 = sshll.u32 %s203_s25, 4  ;;  %s134_s26 = int_to_ptr.vmem [resolvable:$true] %s133_s26 }
  0x17   :  { %v31_v2 = vsub.s32 0, %v30_v1  ;;  %v38_v3 = vsub.s32 1, %v30_v1  ;;  %s171_s27 = scalar_lea.vmem %s134_s26, 32  ;;  %p176_p9 = scmp.lt.s32.totalorder %s134_s26, %s134_s26 }
  0x18   :  { %p172_p8 = scmp.ne.s32.totalorder %s134_s26, %s171_s27  ;;  %p177_p10 = scmp.lt.s32.totalorder %s171_s27, %s171_s27 }
  0x19   :  { %v32_v5 = vrot.slane %v28_v4, %v31_v2  ;;  %v39_v6 = vrot.slane %v28_v4, %v38_v3 }
  0x1a   :  { %p178_p11 = por %p177_p10, %p176_p9 }
  0x1b   :  { %34 = vbcast.lane.b32.xlu0 %v32_v5, 256 }
  0x1c   :  { %p179_p12 = pnand %p178_p11, %p172_p8 }
  0x1f   :  { %41 = vbcast.lane.b32.xlu0 %v39_v6, 256 }
  0x8d   :  { %v35_v7 = vpop.permute.xlu0 %34 }
  0x8e   :  { %vm43_vm0 = vcmp.eq.s32.totalorder %v35_v7, 1  ;;  %vm71_vm1 = vcmp.eq.s32.totalorder %v35_v7, 2  ;;  %vm99_vm2 = vcmp.eq.s32.totalorder %v35_v7, 3 }
  0x8f   :  { %v45_v10 = vsel %vm43_vm0, 0.0, %v200_v9  ;;  %v73_v11 = vsel %vm71_vm1, 0.0, %v200_v9  ;;  %v101_v12 = vsel %vm99_vm2, 0.0, %v200_v9 }
  0x90   :  { %v47_v13 = vadd.f32 %v45_v10, %v26_v8  ;;  %v75_v14 = vadd.f32 %v73_v11, %v26_v8  ;;  %v103_v15 = vadd.f32 %v101_v12, %v26_v8 }
  0x91   :  { %v42_v16 = vpop.permute.xlu0 %41 }
  0x92   :  { %v50_v18 = vsel %vm49_vm3, %v47_v13, -inf  ;;  %v77_v19 = vsel %vm49_vm3, %v75_v14, -inf  ;;  %v105_v20 = vsel %vm49_vm3, %v103_v15, -inf  ;;  %vm44_vm4 = vcmp.eq.s32.totalorder %v42_v16, 1 }
  0x93   :  { %v51_v21 = vrot.slane %v50_v18, 4  ;;  %v78_v22 = vrot.slane %v77_v19, 4  ;;  %v106_v23 = vrot.slane %v105_v20, 4  ;;  %v46_v24 = vsel %vm44_vm4, 0.0, %v200_v9 }
  0x94   :  { %v48_v25 = vadd.f32 %v46_v24, %v27_v17  ;;  %vm72_vm5 = vcmp.eq.s32.totalorder %v42_v16, 2  ;;  %vm100_vm6 = vcmp.eq.s32.totalorder %v42_v16, 3 }
  0x95   :  { %v52_v26 = vmax.f32 %v50_v18, %v51_v21  ;;  %v79_v27 = vmax.f32 %v77_v19, %v78_v22  ;;  %v74_v28 = vsel %vm72_vm5, 0.0, %v200_v9  ;;  %v107_v29 = vmax.f32 %v105_v20, %v106_v23 }
  0x96   :  { %v57_v30 = vsel %vm49_vm3, %v48_v25, -inf  ;;  %v76_v31 = vadd.f32 %v74_v28, %v27_v17  ;;  %v102_v32 = vsel %vm100_vm6, 0.0, %v200_v9 }
  0x97   :  { %v53_v33 = vrot.slane %v52_v26, 2  ;;  %v58_v34 = vrot.slane %v57_v30, 4  ;;  %v104_v35 = vadd.f32 %v102_v32, %v27_v17  ;;  %v80_v36 = vrot.slane %v79_v27, 2 }
  0x98   :  { %v84_v37 = vsel %vm49_vm3, %v76_v31, -inf  ;;  %v108_v46 = vrot.slane %v107_v29, 2 }
  0x99   :  { %v54_v38 = vmax.f32 %v52_v26, %v53_v33  ;;  %v59_v39 = vmax.f32 %v57_v30, %v58_v34  ;;  %v85_v40 = vrot.slane %v84_v37, 4  ;;  %v112_v41 = vsel %vm49_vm3, %v104_v35, -inf }
  0x9a   :  { %v113_v42 = vrot.slane %v112_v41, 4  ;;  %v81_v45 = vmax.f32 %v79_v27, %v80_v36  ;;  %v109_v55 = vmax.f32 %v107_v29, %v108_v46 }
  0x9b   :  { %v60_v43 = vrot.slane %v59_v39, 2  ;;  %v86_v44 = vmax.f32 %v84_v37, %v85_v40  ;;  %v55_v50 = vrot.slane %v54_v38, 1 }
  0x9c   :  { %v114_v47 = vmax.f32 %v112_v41, %v113_v42  ;;  %v82_v53 = vrot.slane %v81_v45, 1  ;;  %v110_v0 = vrot.slane %v109_v55, 1 }
  0x9d   :  { %v61_v48 = vmax.f32 %v59_v39, %v60_v43  ;;  %v87_v49 = vrot.slane %v86_v44, 2  ;;  %v56_v59 = vmax.f32 %v54_v38, %v55_v50 }
  0x9e   :  { %v115_v51 = vrot.slane %v114_v47, 2  ;;  %v83_v61 = vmax.f32 %v81_v45, %v82_v53  ;;  %v111_v3 = vmax.f32 %v109_v55, %v110_v0 }
  0x9f   :  { %v62_v52 = vrot.slane %v61_v48, 1  ;;  %v88_v54 = vmax.f32 %v86_v44, %v87_v49 }
  0xa0   :  { %v116_v56 = vmax.f32 %v114_v47, %v115_v51 }
  0xa1   :  { %v63_v57 = vmax.f32 %v61_v48, %v62_v52  ;;  %v89_v58 = vrot.slane %v88_v54, 1 }
  0xa2   :  { %v117_v60 = vrot.slane %v116_v56, 1 }
  0xa3   :  { %v90_v62 = vmax.f32 %v88_v54, %v89_v58  ;;  %v67_v63 = vsel %vm66_vm7, %v63_v57, %v56_v59 }
  0xa4   :  { %70 = vst.msk [vmem:[#allocation5] sm:$0x3] %vm69_vm8, %v67_v63  ;;  %v118_v2 = vmax.f32 %v116_v56, %v117_v60 }
  0xa5   :  { %v93_v1 = vsel %vm66_vm7, %v90_v62, %v83_v61 }
  0xa6   :  { %94 = vrot.lane.b32.xlu1 %v93_v1, %s201_s0  ;;  %v121_v4 = vsel %vm66_vm7, %v118_v2, %v111_v3 }
  0xaa   :  { %122 = vrot.lane.b32.xlu1 %v121_v4, %s202_s1 }
 0x118   :  { %v95_v5 = vpop.permute.xlu1 %94 }
 0x119   :  { %98 = vst.msk [vmem:[#allocation5] sm:$0x3] %vm97_vm9, %v95_v5 }
 0x11c   :  { %v123_v6 = vpop.permute.xlu1 %122 }
 0x11d   :  { %126 = vst.msk [vmem:[#allocation5] sm:$0x3] %vm125_vm10, %v123_v6 }
 0x11e   :  { %182 = shalt.err (!%p179_p12)
}
 0x11f   :  { %s183_s30 = scalar_lea.hbm %s257_s2, 32 }
 0x120   :  { %p184_p13 = scmp.ne.s32.totalorder %s257_s2, %s183_s30  ;;  %p187_p0 = scmp.lt.u32.totalorder %s183_s30, %s257_s2 }
 0x122   :  { %p189_p1 = pnand %p187_p0, %p184_p13 }
 0x124   :  { %192 = shalt.err (!%p189_p1)
}
 0x125   :  { %136 = dma.vmem_to_hbm [thread:$0]  %s134_s26, 32, %s257_s2, [#allocation4]  }
 0x126   :  { %195 = dma.done.wait [#allocation4], 32  }
 0x127   :  { %196 = vsyncadd [#allocation4], 4294967264 }
 0x128   :  { %140 = vsyncpa [#allocation3], 1 }
 0x129   :  { %141 = vsyncpa [#allocation4], 1 }

</bundles_post_ra>
